<compile_context>
chip_gen: v7x
topology: tpu7x:2x2x1
jax: 0.10.0
libtpu: 0.0.40
codegen_flags: <defaults>
</compile_context>

<pallas_src>
import jax
import jax.numpy as jnp
from jax.experimental import pallas as pl
from jax.experimental.pallas import tpu as pltpu


def _round_up(x, m):
    return ((x + m - 1) // m) * m


def _cdiv(a, b):
    return (a + b - 1) // b


def _vmem_limit_bytes():
    """Generation-aware scoped-VMEM limit (fits v5e/v6e 128 MiB, v7x 64 MiB)."""
    cap = 64 * 1024 * 1024
    try:
        info = pltpu.get_tpu_info()
        cap = int(getattr(info, "vmem_capacity_bytes", None) or cap)
    except Exception:
        pass
    return int(min(cap * 3 // 4, 96 * 1024 * 1024))


def _plan_tiles(n_tokens, d_pad, h_pad, x_item, out_item, comp_item, budget):
    """Pick (tile_n, tile_h, row_granularity).

    tile_h: largest multiple of 128 such that the double-buffered (D,TH)+(TH,D)
    weight slices (+ f32 biases) fit ~half the budget.  tile_n: sized from the
    remainder (x/out double-buffered, f32 accumulator, (TN,TH) intermediate),
    then capped so at least two token tiles exist (v7x megacore)."""
    per_th = 2 * comp_item * 2 * d_pad + 2 * 4
    th = (budget // 2) // max(per_th, 1)
    th = max(128, (th // 128) * 128)
    th = min(th, h_pad)
    weight_bytes = 2 * (2 * d_pad * th * comp_item + th * 4 + d_pad * 4)

    per_tok = (2 * d_pad * x_item + 2 * d_pad * out_item + 4 * d_pad
               + 2 * 4 + th * (4 + comp_item))
    avail = max(budget - weight_bytes, 0)
    gran = 8 if min(x_item, out_item) >= 4 else 16   # bf16 packs 16 rows / vreg
    tn = max(gran, (int(avail // per_tok) // gran) * gran)
    tn = min(tn, 1024)
    # keep >= 2 token tiles where possible so both v7x TensorCores get work
    tn = min(tn, max(gran, _round_up(_cdiv(max(n_tokens, 1), 2), gran)))
    tn = min(tn, _round_up(max(n_tokens, 1), gran))
    return tn, th, gran


def _make_moe_kernel(compute_dtype, num_h):
    def kernel(flags_ref, eff_e_ref, eff_h_ref,   # scalar prefetch (SMEM)
               gw_ref,                            # (1, TN, 1)  f32 gate column
               x_ref,                             # (TN, Dp)    compute dtype
               w1_ref, b1_ref,                    # (1, Dp, TH) cdt / (1, 1, TH) f32
               w2_ref, b2_ref,                    # (1, TH, Dp) cdt / (1, 1, Dp) f32
               o_ref,                             # (TN, Dp)    out dtype
               acc_ref):                          # VMEM scratch (TN, Dp) f32
        i = pl.program_id(0)
        e = pl.program_id(1)
        h = pl.program_id(2)
        n_e = pl.num_programs(1)
        n_h = pl.num_programs(2)

        @pl.when(jnp.logical_and(e == 0, h == 0))
        def _():
            acc_ref[...] = jnp.zeros_like(acc_ref)

        # Skip experts with no routed token in this tile.  Their weight/bias/
        # gate DMAs are also elided: the index_maps repeat the previous step's
        # block indices, so Pallas does not refetch the (unchanged) blocks.
        @pl.when(flags_ref[i * n_e + e] != 0)
        def _():
            x = x_ref[...]                                        # (TN, Dp)
            hblk = jnp.dot(x, w1_ref[0],
                           preferred_element_type=jnp.float32) + b1_ref[0]
            hblk = jnp.maximum(hblk, 0.0)                         # ReLU
            # TODO(synk): dropout is identity at inference; training-mode dropout not implemented.
            y = jnp.dot(hblk.astype(compute_dtype), w2_ref[0],
                        preferred_element_type=jnp.float32)       # (TN, Dp) f32
            if num_h == 1:
                y = y + b2_ref[0]
            else:
                y = y + jnp.where(h == 0, b2_ref[0], jnp.zeros_like(b2_ref[0]))
            acc_ref[...] += gw_ref[0] * y                         # (TN,1) gate col

        @pl.when(jnp.logical_and(e == n_e - 1, h == n_h - 1))
        def _():
            o_ref[...] = acc_ref[...].astype(o_ref.dtype)

    return kernel


def moe_ffn_pallas(x_flat, gw, w1, b1, w2, b2, *,
                   compute_dtype=jnp.bfloat16, tile_n=None):
    N, D = x_flat.shape
    E, _, H = w1.shape
    out_dtype = x_flat.dtype

    comp = jnp.dtype(compute_dtype)
    x_item = comp.itemsize            # x tile is stored in the compute dtype
    out_item = jnp.dtype(out_dtype).itemsize

    # Pad model/hidden dims to lane multiples (zero padding keeps semantics exact).
    Dp, Hp = _round_up(D, 128), _round_up(H, 128)

    vmem_limit = _vmem_limit_bytes()
    auto_tn, tile_h, gran = _plan_tiles(N, Dp, Hp, x_item, out_item,
                                        comp.itemsize, vmem_limit * 3 // 4)
    if tile_n is None:
        tile_n = auto_tn
    tile_n = _round_up(max(min(int(tile_n), _round_up(N, gran)), gran), gran)
    num_h = _cdiv(Hp, tile_h)
    Hp = num_h * tile_h               # re-pad H so tile_h divides it exactly

    num_tiles = _cdiv(N, tile_n)
    N_pad = num_tiles * tile_n

    # --- pad + cast operands -------------------------------------------------
    x_p = jnp.pad(x_flat, ((0, N_pad - N), (0, Dp - D))).astype(compute_dtype)
    gw_p = jnp.pad(gw.astype(jnp.float32), ((0, N_pad - N), (0, 0)))
    w1_p = jnp.pad(w1, ((0, 0), (0, Dp - D), (0, Hp - H))).astype(compute_dtype)
    w2_p = jnp.pad(w2, ((0, 0), (0, Hp - H), (0, Dp - D))).astype(compute_dtype)
    b1_p = jnp.pad(b1, ((0, 0), (0, 0), (0, Hp - H))).astype(jnp.float32)
    b2_p = jnp.pad(b2, ((0, 0), (0, 0), (0, Dp - D))).astype(jnp.float32)
    # Gate kept f32 end-to-end.  Block (1, tile_n, 1) is not lane-dense, but it
    # is only tile_n*4 bytes and DMA'd at most once per active (tile, expert).
    gw_t = jnp.transpose(gw_p, (1, 0))[:, :, None]                # (E, N_pad, 1)

    # --- per-(tile, expert) activity + DMA-eliding effective block indices ---
    active = gw_p.reshape(num_tiles, tile_n, E).max(axis=1) > 0   # (tiles, E)
    flags = active.astype(jnp.int32).reshape(-1)                  # (tiles*E,)
    n_steps = num_tiles * E * num_h
    step = jnp.arange(n_steps, dtype=jnp.int32)                   # grid order (i,e,h)
    step_e = (step // num_h) % E
    step_h = step % num_h
    act_step = jnp.repeat(active.reshape(-1), num_h)
    last_active = jax.lax.cummax(jnp.where(act_step, step, -1), axis=0)
    safe = jnp.maximum(last_active, 0)
    eff_e = step_e[safe]          # dead steps repeat the previously fetched
    eff_h = step_h[safe]          #   (expert, H-block) -> Pallas skips the DMA

    nh, nhe = num_h, num_h * E

    def w1_map(i, e, h, flags, eff_e, eff_h):
        t = i * nhe + e * nh + h
        return (eff_e[t], 0, eff_h[t])

    def b1_map(i, e, h, flags, eff_e, eff_h):
        t = i * nhe + e * nh + h
        return (eff_e[t], 0, eff_h[t])

    def w2_map(i, e, h, flags, eff_e, eff_h):
        t = i * nhe + e * nh + h
        return (eff_e[t], eff_h[t], 0)

    def b2_map(i, e, h, flags, eff_e, eff_h):
        t = i * nhe + e * nh + h
        return (eff_e[t], 0, 0)

    def gw_map(i, e, h, flags, eff_e, eff_h):
        t = i * nhe + e * nh + h
        return (eff_e[t], i, 0)

    def x_map(i, e, h, *_):
        return (i, 0)

    out = pl.pallas_call(
        _make_moe_kernel(compute_dtype, num_h),
        out_shape=jax.ShapeDtypeStruct((N_pad, Dp), out_dtype),
        grid_spec=pltpu.PrefetchScalarGridSpec(
            num_scalar_prefetch=3,
            grid=(num_tiles, E, num_h),
            in_specs=[
                pl.BlockSpec((1, tile_n, 1), gw_map),      # gate column (f32)
                pl.BlockSpec((tile_n, Dp), x_map),         # token tile
                pl.BlockSpec((1, Dp, tile_h), w1_map),     # w1[e][:, h-block]
                pl.BlockSpec((1, 1, tile_h), b1_map),      # b1[e][h-block]
                pl.BlockSpec((1, tile_h, Dp), w2_map),     # w2[e][h-block, :]
                pl.BlockSpec((1, 1, Dp), b2_map),          # b2[e]
            ],
            out_specs=pl.BlockSpec((tile_n, Dp), x_map),
            scratch_shapes=[pltpu.VMEM((tile_n, Dp), jnp.float32)],
        ),
        compiler_params=pltpu.CompilerParams(
            dimension_semantics=("parallel", "arbitrary", "arbitrary"),
            vmem_limit_bytes=int(vmem_limit)),
    )(flags, eff_e, eff_h, gw_t, x_p, w1_p, b1_p, w2_p, b2_p)

    return out[:N, :D]


def moe_ffn_layer(xs, params, n_expert_per_token, *,
                  compute_dtype=jnp.bfloat16, tile_n=None):
    """xs: (B, L, D) -> (B, L, D). Matches MoEFFNLayer.forward semantics."""
    B, L, D = xs.shape
    E = params["gate_w"].shape[0]
    x_flat = xs.reshape(-1, D)

    # --- gating glue (tiny): router matmul + top-k + softmax, plain JAX ------
    router = x_flat @ params["gate_w"].T                           # (N, E)
    logits, indices = jax.lax.top_k(router, n_expert_per_token)
    weights = jax.nn.softmax(logits.astype(jnp.float32), axis=-1)  # keep f32
    onehot = jax.nn.one_hot(indices, E, dtype=jnp.float32)         # (N, K, E)
    gw = jnp.einsum("nk,nke->ne", weights, onehot)                 # dense (N, E) f32

    # --- hot path (per-expert FFN + weighted accumulation) in Pallas ---------
    out = moe_ffn_pallas(x_flat, gw,
                         params["w1"], params["b1"],
                         params["w2"], params["b2"],
                         compute_dtype=compute_dtype, tile_n=tile_n)
    return out.reshape(B, L, D)


def init_params(key, n_expert, idim, hidden_units, dtype=jnp.float32):
    k1, k2, k3, k4, k5 = jax.random.split(key, 5)
    scale_in = 1.0 / jnp.sqrt(idim)
    scale_h = 1.0 / jnp.sqrt(hidden_units)
    return {
        # gate: Linear(idim, n_expert, bias=False) -> weight (E, D)
        "gate_w": jax.random.uniform(k1, (n_expert, idim), dtype, -scale_in, scale_in),
        # expert i: w_1 Linear(D, H), w_2 Linear(H, D); stored transposed for x @ w
        "w1": jax.random.uniform(k2, (n_expert, idim, hidden_units), dtype, -scale_in, scale_in),
        "b1": jax.random.uniform(k3, (n_expert, 1, hidden_units), dtype, -scale_in, scale_in),
        "w2": jax.random.uniform(k4, (n_expert, hidden_units, idim), dtype, -scale_h, scale_h),
        "b2": jax.random.uniform(k5, (n_expert, 1, idim), dtype, -scale_h, scale_h),
    }


def moe_ffn_reference(xs, params, n_expert_per_token):
    """Pure-JAX reference mirroring the PyTorch forward (dense formulation)."""
    B, L, D = xs.shape
    E = params["gate_w"].shape[0]
    x = xs.reshape(-1, D)
    router = x @ params["gate_w"].T
    logits, indices = jax.lax.top_k(router, n_expert_per_token)
    weights = jax.nn.softmax(logits.astype(jnp.float32), axis=-1).astype(xs.dtype)
    onehot = jax.nn.one_hot(indices, E, dtype=xs.dtype)
    gw = jnp.einsum("nk,nke->ne", weights, onehot)
    out = jnp.zeros_like(x)
    for e in range(E):
        h = jnp.maximum(x @ params["w1"][e] + params["b1"][e], 0.0)
        y = h @ params["w2"][e] + params["b2"][e]
        out = out + gw[:, e:e + 1] * y
    return out.reshape(B, L, D)


if __name__ == "__main__":
    key = jax.random.PRNGKey(0)

    # Test 1: exact-semantics check (f32 compute), lane-aligned dims, auto tile
    #         size -> 2 token tiles (exercises the megacore-friendly split).
    B, L, D, H, E, K = 2, 8, 128, 256, 4, 2
    kx, kp = jax.random.split(key)
    xs = jax.random.normal(kx, (B, L, D), dtype=jnp.float32)
    params = init_params(kp, E, D, H)
    out = jax.block_until_ready(
        moe_ffn_layer(xs, params, K, compute_dtype=jnp.float32))
    ref = moe_ffn_reference(xs, params, K)
    assert out.shape == (B, L, D)
    assert jnp.allclose(out, ref, atol=1e-4, rtol=1e-4), "mismatch (test 1, f32)"

    # Test 2: default bf16 MXU path, forced tiny token tile (rounded to the
    #         bf16 granularity of 16) -> multi-tile grid, tail padding, and the
    #         dead-expert DMA/compute skip on the partially-padded last tile.
    B2, L2 = 2, 9                                   # N = 18 -> padded
    kx2, kp2 = jax.random.split(jax.random.PRNGKey(1))
    xs2 = jax.random.normal(kx2, (B2, L2, D), dtype=jnp.float32)
    params2 = init_params(kp2, E, D, H)
    out2 = jax.block_until_ready(moe_ffn_layer(xs2, params2, K, tile_n=8))
    ref2 = moe_ffn_reference(xs2, params2, K)
    assert out2.shape == (B2, L2, D)
    assert jnp.allclose(out2, ref2, atol=5e-2, rtol=5e-2), "mismatch (test 2, bf16)"

    # Test 3: non-lane-aligned D/H (zero-padding path) in f32.
    B3, L3, D3, H3, E3, K3 = 1, 12, 96, 160, 3, 1
    kx3, kp3 = jax.random.split(jax.random.PRNGKey(2))
    xs3 = jax.random.normal(kx3, (B3, L3, D3), dtype=jnp.float32)
    params3 = init_params(kp3, E3, D3, H3)
    out3 = jax.block_until_ready(
        moe_ffn_layer(xs3, params3, K3, compute_dtype=jnp.float32))
    ref3 = moe_ffn_reference(xs3, params3, K3)
    assert out3.shape == (B3, L3, D3)
    assert jnp.allclose(out3, ref3, atol=1e-4, rtol=1e-4), "mismatch (test 3, padded dims)"

    print("KERNEL_OK")
</pallas_src>

<mosaic_0001>
module attributes {stable_mosaic.version = 11 : i64} {
  func.func @kernel(%arg0: i32, %arg1: i32, %arg2: i32, %arg3: memref<8xi32, #tpu.memory_space<smem>>, %arg4: memref<8xi32, #tpu.memory_space<smem>>, %arg5: memref<8xi32, #tpu.memory_space<smem>>, %arg6: memref<1x8x1xf32, #tpu.memory_space<vmem>>, %arg7: memref<8x128xf32, #tpu.memory_space<vmem>>, %arg8: memref<1x128x256xf32, #tpu.memory_space<vmem>>, %arg9: memref<1x1x256xf32, #tpu.memory_space<vmem>>, %arg10: memref<1x256x128xf32, #tpu.memory_space<vmem>>, %arg11: memref<1x1x128xf32, #tpu.memory_space<vmem>>, %arg12: memref<8x128xf32, #tpu.memory_space<vmem>>, %arg13: memref<8x128xf32, #tpu.memory_space<vmem>>) attributes {dimension_semantics = [#tpu.dimension_semantics<parallel>, #tpu.dimension_semantics<arbitrary>, #tpu.dimension_semantics<arbitrary>], iteration_bounds = array<i64: 2, 4, 1>, scalar_prefetch = 3 : i64, scratch_operands = 1 : i64, tpu.core_type = #tpu.core_type<tc>, window_params = [{transform_indices = @transform_0, window_bounds = array<i64: 1, 8, 1>}, {transform_indices = @transform_1, window_bounds = array<i64: 8, 128>}, {transform_indices = @transform_2, window_bounds = array<i64: 1, 128, 256>}, {transform_indices = @transform_3, window_bounds = array<i64: 1, 1, 256>}, {transform_indices = @transform_4, window_bounds = array<i64: 1, 256, 128>}, {transform_indices = @transform_5, window_bounds = array<i64: 1, 1, 128>}, {transform_indices = @transform_6, window_bounds = array<i64: 8, 128>}]} {
    %c0_i32 = arith.constant 0 : i32
    %0 = arith.cmpi eq, %arg1, %c0_i32 : i32
    %c0_i32_0 = arith.constant 0 : i32
    %1 = arith.cmpi eq, %arg2, %c0_i32_0 : i32
    %2 = arith.andi %0, %1 : i1
    %3 = arith.extui %2 : i1 to i32
    %c0_i32_1 = arith.constant 0 : i32
    %4 = arith.cmpi ne, %3, %c0_i32_1 : i32
    scf.if %4 {
      %cst = arith.constant 0.000000e+00 : f32
      %17 = vector.broadcast %cst : f32 to vector<8x128xf32>
      %c0 = arith.constant 0 : index
      %c0_6 = arith.constant 0 : index
      %18 = vector.load %arg13[%c0, %c0_6] : memref<8x128xf32, #tpu.memory_space<vmem>>, vector<8x128xf32>
      tpu.vector_store %arg13[%c0, %c0_6], %17 {strides = array<i32>} : memref<8x128xf32, #tpu.memory_space<vmem>>, vector<8x128xf32>,
    } else {
    }
    %c4_i32 = arith.constant 4 : i32
    %5 = arith.muli %arg0, %c4_i32 : i32
    %6 = arith.addi %5, %arg1 : i32
    %7 = arith.index_cast %6 : i32 to index
    %8 = memref.load %arg3[%7] : memref<8xi32, #tpu.memory_space<smem>>
    %c0_i32_2 = arith.constant 0 : i32
    %9 = arith.cmpi ne, %8, %c0_i32_2 : i32
    %10 = arith.extui %9 : i1 to i32
    %c0_i32_3 = arith.constant 0 : i32
    %11 = arith.cmpi ne, %10, %c0_i32_3 : i32
    scf.if %11 {
      %c0 = arith.constant 0 : index
      %c0_6 = arith.constant 0 : index
      %17 = vector.load %arg7[%c0, %c0_6] : memref<8x128xf32, #tpu.memory_space<vmem>>, vector<8x128xf32>
      %c0_7 = arith.constant 0 : index
      %c0_8 = arith.constant 0 : index
      %c0_9 = arith.constant 0 : index
      %18 = vector.load %arg8[%c0_7, %c0_8, %c0_9] : memref<1x128x256xf32, #tpu.memory_space<vmem>>, vector<1x128x256xf32>
      %19 = vector.shape_cast %18 : vector<1x128x256xf32> to vector<128x256xf32>
      %cst = arith.constant dense<0.000000e+00> : vector<8x256xf32>
      %20 = tpu.matmul %17, %19, %cst {dimension_numbers = #tpu.dot_dimension_numbers<[1], [0], [0], [1], [0, 0, 1, 1], [], []>} : vector<8x128xf32>, vector<128x256xf32>, vector<8x256xf32> -> vector<8x256xf32>
      %c0_10 = arith.constant 0 : index
      %c0_11 = arith.constant 0 : index
      %c0_12 = arith.constant 0 : index
      %21 = vector.load %arg9[%c0_10, %c0_11, %c0_12] : memref<1x1x256xf32, #tpu.memory_space<vmem>>, vector<1x1x256xf32>
      %22 = vector.shape_cast %21 : vector<1x1x256xf32> to vector<1x256xf32>
      %23 = vector.broadcast %22 : vector<1x256xf32> to vector<8x256xf32>
      %24 = arith.addf %20, %23 : vector<8x256xf32>
      %cst_13 = arith.constant 0.000000e+00 : f32
      %25 = vector.broadcast %cst_13 : f32 to vector<8x256xf32>
      %26 = arith.maximumf %24, %25 : vector<8x256xf32>
      %c0_14 = arith.constant 0 : index
      %c0_15 = arith.constant 0 : index
      %c0_16 = arith.constant 0 : index
      %27 = vector.load %arg10[%c0_14, %c0_15, %c0_16] : memref<1x256x128xf32, #tpu.memory_space<vmem>>, vector<1x256x128xf32>
      %28 = vector.shape_cast %27 : vector<1x256x128xf32> to vector<256x128xf32>
      %cst_17 = arith.constant dense<0.000000e+00> : vector<8x128xf32>
      %29 = tpu.matmul %26, %28, %cst_17 {dimension_numbers = #tpu.dot_dimension_numbers<[1], [0], [0], [1], [0, 0, 1, 1], [], []>} : vector<8x256xf32>, vector<256x128xf32>, vector<8x128xf32> -> vector<8x128xf32>
      %c0_18 = arith.constant 0 : index
      %c0_19 = arith.constant 0 : index
      %c0_20 = arith.constant 0 : index
      %30 = vector.load %arg11[%c0_18, %c0_19, %c0_20] : memref<1x1x128xf32, #tpu.memory_space<vmem>>, vector<1x1x128xf32>
      %31 = vector.shape_cast %30 : vector<1x1x128xf32> to vector<1x128xf32>
      %32 = vector.broadcast %31 : vector<1x128xf32> to vector<8x128xf32>
      %33 = arith.addf %29, %32 : vector<8x128xf32>
      %c0_21 = arith.constant 0 : index
      %c0_22 = arith.constant 0 : index
      %34 = vector.load %arg13[%c0_21, %c0_22] : memref<8x128xf32, #tpu.memory_space<vmem>>, vector<8x128xf32>
      %c0_23 = arith.constant 0 : index
      %c0_24 = arith.constant 0 : index
      %c0_25 = arith.constant 0 : index
      %35 = vector.load %arg6[%c0_23, %c0_24, %c0_25] : memref<1x8x1xf32, #tpu.memory_space<vmem>>, vector<1x8x1xf32>
      %36 = vector.shape_cast %35 : vector<1x8x1xf32> to vector<8x1xf32>
      %37 = vector.broadcast %36 : vector<8x1xf32> to vector<8x128xf32>
      %38 = arith.mulf %37, %33 : vector<8x128xf32>
      %39 = arith.addf %34, %38 : vector<8x128xf32>
      %c0_26 = arith.constant 0 : index
      %c0_27 = arith.constant 0 : index
      %40 = vector.load %arg13[%c0_26, %c0_27] : memref<8x128xf32, #tpu.memory_space<vmem>>, vector<8x128xf32>
      tpu.vector_store %arg13[%c0_26, %c0_27], %39 {strides = array<i32>} : memref<8x128xf32, #tpu.memory_space<vmem>>, vector<8x128xf32>,
    } else {
    }
    %c3_i32 = arith.constant 3 : i32
    %12 = arith.cmpi eq, %arg1, %c3_i32 : i32
    %c0_i32_4 = arith.constant 0 : i32
    %13 = arith.cmpi eq, %arg2, %c0_i32_4 : i32
    %14 = arith.andi %12, %13 : i1
    %15 = arith.extui %14 : i1 to i32
    %c0_i32_5 = arith.constant 0 : i32
    %16 = arith.cmpi ne, %15, %c0_i32_5 : i32
    scf.if %16 {
      %c0 = arith.constant 0 : index
      %c0_6 = arith.constant 0 : index
      %17 = vector.load %arg13[%c0, %c0_6] : memref<8x128xf32, #tpu.memory_space<vmem>>, vector<8x128xf32>
      %c0_7 = arith.constant 0 : index
      %c0_8 = arith.constant 0 : index
      %18 = vector.load %arg12[%c0_7, %c0_8] : memref<8x128xf32, #tpu.memory_space<vmem>>, vector<8x128xf32>
      tpu.vector_store %arg12[%c0_7, %c0_8], %17 {strides = array<i32>} : memref<8x128xf32, #tpu.memory_space<vmem>>, vector<8x128xf32>,
    } else {
    }
    return
  }
  func.func @transform_0(%arg0: i32, %arg1: i32, %arg2: i32, %arg3: memref<8xi32, #tpu.memory_space<smem>>, %arg4: memref<8xi32, #tpu.memory_space<smem>>, %arg5: memref<8xi32, #tpu.memory_space<smem>>) -> (i32, i32, i32) {
    %c4_i32 = arith.constant 4 : i32
    %0 = arith.muli %arg0, %c4_i32 : i32
    %c1_i32 = arith.constant 1 : i32
    %1 = arith.muli %arg1, %c1_i32 : i32
    %2 = arith.addi %0, %1 : i32
    %3 = arith.addi %2, %arg2 : i32
    %4 = arith.index_cast %3 : i32 to index
    %5 = memref.load %arg4[%4] : memref<8xi32, #tpu.memory_space<smem>>
    %c0_i32 = arith.constant 0 : i32
    %c0_i32_0 = arith.constant 0 : i32
    return %5, %arg0, %c0_i32 : i32, i32, i32
  }
  func.func @transform_1(%arg0: i32, %arg1: i32, %arg2: i32, %arg3: memref<8xi32, #tpu.memory_space<smem>>, %arg4: memref<8xi32, #tpu.memory_space<smem>>, %arg5: memref<8xi32, #tpu.memory_space<smem>>) -> (i32, i32) {
    %c0_i32 = arith.constant 0 : i32
    %c0_i32_0 = arith.constant 0 : i32
    return %arg0, %c0_i32 : i32, i32
  }
  func.func @transform_2(%arg0: i32, %arg1: i32, %arg2: i32, %arg3: memref<8xi32, #tpu.memory_space<smem>>, %arg4: memref<8xi32, #tpu.memory_space<smem>>, %arg5: memref<8xi32, #tpu.memory_space<smem>>) -> (i32, i32, i32) {
    %c4_i32 = arith.constant 4 : i32
    %0 = arith.muli %arg0, %c4_i32 : i32
    %c1_i32 = arith.constant 1 : i32
    %1 = arith.muli %arg1, %c1_i32 : i32
    %2 = arith.addi %0, %1 : i32
    %3 = arith.addi %2, %arg2 : i32
    %4 = arith.index_cast %3 : i32 to index
    %5 = memref.load %arg4[%4] : memref<8xi32, #tpu.memory_space<smem>>
    %6 = arith.index_cast %3 : i32 to index
    %7 = memref.load %arg5[%6] : memref<8xi32, #tpu.memory_space<smem>>
    %c0_i32 = arith.constant 0 : i32
    %c0_i32_0 = arith.constant 0 : i32
    return %5, %c0_i32, %7 : i32, i32, i32
  }
  func.func @transform_3(%arg0: i32, %arg1: i32, %arg2: i32, %arg3: memref<8xi32, #tpu.memory_space<smem>>, %arg4: memref<8xi32, #tpu.memory_space<smem>>, %arg5: memref<8xi32, #tpu.memory_space<smem>>) -> (i32, i32, i32) {
    %c4_i32 = arith.constant 4 : i32
    %0 = arith.muli %arg0, %c4_i32 : i32
    %c1_i32 = arith.constant 1 : i32
    %1 = arith.muli %arg1, %c1_i32 : i32
    %2 = arith.addi %0, %1 : i32
    %3 = arith.addi %2, %arg2 : i32
    %4 = arith.index_cast %3 : i32 to index
    %5 = memref.load %arg4[%4] : memref<8xi32, #tpu.memory_space<smem>>
    %6 = arith.index_cast %3 : i32 to index
    %7 = memref.load %arg5[%6] : memref<8xi32, #tpu.memory_space<smem>>
    %c0_i32 = arith.constant 0 : i32
    %c0_i32_0 = arith.constant 0 : i32
    return %5, %c0_i32, %7 : i32, i32, i32
  }
  func.func @transform_4(%arg0: i32, %arg1: i32, %arg2: i32, %arg3: memref<8xi32, #tpu.memory_space<smem>>, %arg4: memref<8xi32, #tpu.memory_space<smem>>, %arg5: memref<8xi32, #tpu.memory_space<smem>>) -> (i32, i32, i32) {
    %c4_i32 = arith.constant 4 : i32
    %0 = arith.muli %arg0, %c4_i32 : i32
    %c1_i32 = arith.constant 1 : i32
    %1 = arith.muli %arg1, %c1_i32 : i32
    %2 = arith.addi %0, %1 : i32
    %3 = arith.addi %2, %arg2 : i32
    %4 = arith.index_cast %3 : i32 to index
    %5 = memref.load %arg4[%4] : memref<8xi32, #tpu.memory_space<smem>>
    %6 = arith.index_cast %3 : i32 to index
    %7 = memref.load %arg5[%6] : memref<8xi32, #tpu.memory_space<smem>>
    %c0_i32 = arith.constant 0 : i32
    %c0_i32_0 = arith.constant 0 : i32
    return %5, %7, %c0_i32 : i32, i32, i32
  }
  func.func @transform_5(%arg0: i32, %arg1: i32, %arg2: i32, %arg3: memref<8xi32, #tpu.memory_space<smem>>, %arg4: memref<8xi32, #tpu.memory_space<smem>>, %arg5: memref<8xi32, #tpu.memory_space<smem>>) -> (i32, i32, i32) {
    %c4_i32 = arith.constant 4 : i32
    %0 = arith.muli %arg0, %c4_i32 : i32
    %c1_i32 = arith.constant 1 : i32
    %1 = arith.muli %arg1, %c1_i32 : i32
    %2 = arith.addi %0, %1 : i32
    %3 = arith.addi %2, %arg2 : i32
    %4 = arith.index_cast %3 : i32 to index
    %5 = memref.load %arg4[%4] : memref<8xi32, #tpu.memory_space<smem>>
    %c0_i32 = arith.constant 0 : i32
    %c0_i32_0 = arith.constant 0 : i32
    %c0_i32_1 = arith.constant 0 : i32
    return %5, %c0_i32, %c0_i32_0 : i32, i32, i32
  }
  func.func @transform_6(%arg0: i32, %arg1: i32, %arg2: i32, %arg3: memref<8xi32, #tpu.memory_space<smem>>, %arg4: memref<8xi32, #tpu.memory_space<smem>>, %arg5: memref<8xi32, #tpu.memory_space<smem>>) -> (i32, i32) {
    %c0_i32 = arith.constant 0 : i32
    %c0_i32_0 = arith.constant 0 : i32
    return %arg0, %c0_i32 : i32, i32
  }
}

</mosaic_0001>

<bundles_post_ra>
// kernel: tpu_custom_call.1
= control target key start
LH: loop header
LB: loop body
LE: loop exit
PB: predicated region body
PF: predicated region fallthrough
CT: control target
= control target key end

     0   :  { %s2156_s0 = inlined_call_operand.vmem [shape: s32[8], index: 0, kind: input, shape index: {}]   ;;  %s2157_s3 = inlined_call_operand.vmem [shape: f32[4,16,1], index: 3, kind: input, shape index: {}]   ;;  %s2158_s4 = inlined_call_operand.vmem [shape: f32[16,128], index: 4, kind: input, shape index: {}]   ;;  %s2159_s5 = inlined_call_operand.hbm [shape: f32[4,128,256], index: 5, kind: input, shape index: {}]   ;;  %s2160_s6 = inlined_call_operand.vmem [shape: f32[4,1,256], index: 6, kind: input, shape index: {}]   ;;  %s2161_s7 = inlined_call_operand.hbm [shape: f32[4,256,128], index: 7, kind: input, shape index: {}]   ;;  %s2162_s8 = inlined_call_operand.vmem [shape: f32[4,1,128], index: 8, kind: input, shape index: {}]   ;;  %s2163_s9 = inlined_call_operand.hbm [shape: f32[16,128], index: 9, kind: output, shape index: {}]   ;;  %s2164_s1 = inlined_call_operand.vmem [shape: s32[8], index: 1, kind: input, shape index: {}]   ;;  %s2165_s2 = inlined_call_operand.vmem [shape: s32[8], index: 2, kind: input, shape index: {}]  }
   0x1   :  { %2187 = sst [smem:[#allocation37_spill]] %s2157_s3  ;;  %s14_s11 = sshll.u32 %s2156_s0, 4  ;;  %s15_s11 = int_to_ptr.vmem [resolvable:$true] %s14_s11 }
   0x2   :  { %2188 = sst [smem:[#allocation38_spill]] %s2158_s4  ;;  %s18_s14 = sshll.u32 %s2164_s1, 4  ;;  %s19_s14 = int_to_ptr.vmem [resolvable:$true] %s18_s14 }
   0x3   :  { %2189 = sst [smem:[#allocation39_spill]] %s2159_s5  ;;  %s1325_s15 = scalar_lea.vmem %s15_s11, 16 }
   0x4   :  { %2190 = sst [smem:[#allocation40_spill]] %s2160_s6  ;;  %p1326_p0 = scmp.ne.s32.totalorder %s15_s11, %s1325_s15 }
   0x5   :  { %2191 = sst [smem:[#allocation41_spill]] %s2161_s7  ;;  %p1330_p1 = scmp.lt.s32.totalorder %s15_s11, %s15_s11 }
   0x6   :  { %2192 = sst [smem:[#allocation42_spill]] %s2162_s8  ;;  %p1331_p2 = scmp.lt.s32.totalorder %s1325_s15, %s1325_s15 }
   0x7   :  { %2193 = sst [smem:[#allocation43_spill]] %s2163_s9 }
   0x8   :  { %p1332_p3 = por %p1331_p2, %p1330_p1 }
   0xa   :  { %p1333_p4 = pnand %p1332_p3, %p1326_p0 }
   0xc   :  { %1336 = shalt.err (!%p1333_p4)  }
   0xd   :  { %s1575_s16 = smov [#allocation4]   ;;  %s1337_s17 = scalar_lea.vmem %s19_s14, 16 }
   0xe   :  { %17 = dma.vmem_to_smem %s15_s11, 16, %s1575_s16, [#allocation3] }
   0xf   :  { %p1338_p5 = scmp.ne.s32.totalorder %s19_s14, %s1337_s17  ;;  %p1342_p6 = scmp.lt.s32.totalorder %s19_s14, %s19_s14 }
  0x10   :  { %p1343_p7 = scmp.lt.s32.totalorder %s1337_s17, %s1337_s17 }
  0x12   :  { %p1344_p8 = por %p1343_p7, %p1342_p6 }
  0x14   :  { %p1345_p9 = pnand %p1344_p8, %p1338_p5 }
  0x16   :  { %1348 = shalt.err (!%p1345_p9)  }
  0x17   :  { %s1576_s0 = smov [#allocation5]   ;;  %s22_s19 = sshll.u32 %s2165_s2, 4  ;;  %s23_s19 = int_to_ptr.vmem [resolvable:$true] %s22_s19 }
  0x18   :  { %21 = dma.vmem_to_smem %s19_s14, 16, %s1576_s0, [#allocation3] }
  0x19   :  { %s1349_s20 = scalar_lea.vmem %s23_s19, 16  ;;  %p1354_p11 = scmp.lt.s32.totalorder %s23_s19, %s23_s19 }
  0x1a   :  { %p1350_p10 = scmp.ne.s32.totalorder %s23_s19, %s1349_s20  ;;  %p1355_p12 = scmp.lt.s32.totalorder %s1349_s20, %s1349_s20 }
  0x1c   :  { %p1356_p13 = por %p1355_p12, %p1354_p11 }
  0x1e   :  { %p1357_p0 = pnand %p1356_p13, %p1350_p10 }
  0x20   :  { %1360 = shalt.err (!%p1357_p0)  }
  0x21   :  { %s1577_s21 = smov [#allocation6]  }
  0x22   :  { %25 = dma.vmem_to_smem %s23_s19, 16, %s1577_s21, [#allocation3] }
  0x23   :  { %1505 = dma.done.wait [#allocation3], 48 }
  0x24   :  { %1506 = vsyncadd [#allocation3], 4294967248 }
  0x25   :  { %27 = sfence }
  0x26   :  { %28 = vsyncpa [#allocation8], 0 }
  0x27   :  { %30 = vsyncpa [#allocation8 + $0x1], 0 }
  0x28   :  { %31 = vsyncpa [#allocation11], 0 }
  0x29   :  { %33 = vsyncpa [#allocation11 + $0x1], 0 }
  0x2a   :  { %34 = vsyncpa [#allocation9], 0 }
  0x2b   :  { %36 = vsyncpa [#allocation9 + $0x1], 0  ;;  %s1647_s2 = smov 0   ;;  %s1649_s22 = smov 0  }
  0x2c   :  { %s1651_s23 = smov 0   ;;  %s1653_s24 = smov 0  }
  0x2d   :  { %s1655_s25 = smov 0   ;;  %s1657_s26 = smov 0  }
  0x2e   :  { %s1659_s27 = smov 0   ;;  %s1661_s28 = smov 0  }
  0x2f   :  { %s1663_s29 = smov 0   ;;  %s1665_s30 = smov 0  }
  0x30   :  { %s1667_s10 = smov 0   ;;  %s1669_s11 = smov 0  }
  0x31   :  { %s1671_s12 = smov 0   ;;  %s1673_s13 = smov 0  }
  0x32 LB: > { %2194 = sst [smem:[#allocation25_spill]] %s1541_s26  ;;  %s57_s14 = sadd.s32 1, %s1565_s11  ;;  %s1573_s13 = sphi %s1673_s13, %s42_s13   ;;  %s1569_s12 = sphi %s1671_s12, %s2252_s12   ;;  %s1565_s11 = sphi %s1669_s11, %s2251_s11   ;;  %s1561_s10 = sphi %s1667_s10, %s2250_s10   ;;  %s1557_s30 = sphi %s1665_s30, %s2259_s30   ;;  %s1553_s29 = sphi %s1663_s29, %s2248_s29   ;;  %s1549_s28 = sphi %s1661_s28, %s2247_s28   ;;  %s1545_s27 = sphi %s1659_s27, %s2246_s27   ;;  %s1541_s26 = sphi %s1657_s26, %s2245_s26   ;;  %s1537_s25 = sphi %s1655_s25, %s2258_s25   ;;  %s1533_s24 = sphi %s1653_s24, %s2257_s24   ;;  %s1529_s23 = sphi %s1651_s23, %s2256_s23   ;;  %s1525_s22 = sphi %s1649_s22, %s2255_s22   ;;  %s1521_s2 = sphi %s1647_s2, %s2254_s2  }
  0x33   : > { %2195 = sst [smem:[#allocation26_spill]] %s1549_s28  ;;  %s61_s15 = sadd.s32 1, %s1569_s12 }
  0x34   : > { %2196 = sst [smem:[#allocation27_spill]] %s1553_s29  ;;  %p59_p1 = scmp.ge.s32.totalorder %s57_s14, 4 }
  0x35   : > { %2197 = sst [smem:[#allocation28_spill]] %s1557_s30  ;;  %s1025_s16 = sshll.u32 %s1569_s12, 2 }
  0x36   : > { %2198 = sst [smem:[#allocation29_spill]] %s1561_s10  ;;  %s2168_s17 = sadd.s32 4294967295, %s1573_s13  }
  0x37   : > { %2199 = sst [smem:[#allocation30_spill]] %s1565_s11  ;;  %s1720_s0 = sadd.s32 %s1565_s11, %s1025_s16 }
  0x38   : > { %2200 = sst [smem:[#allocation31_spill]] %s1569_s12  ;;  %s2261_s14 = smov (%p59_p1, %s57_s14), 0 }
  0x39   : > { %2201 = sst [smem:[#allocation32_spill]] %s2261_s14  ;;  %s2263_s15 = smov (!%p59_p1, %s61_s15), %s1569_s12 }
  0x3a   : > { %s130_s18 = sld [smem:[#allocation5 + %s1720_s0]]  ;;  %p63_p2 = scmp.ge.s32.totalorder %s2263_s15, 2 }
  0x3b   : > { %s131_s19 = sld [smem:[#allocation6 + %s1720_s0]]  ;;  %p149_p3 = scmp.ne.s32.totalorder %s1553_s29, %s1549_s28 }
  0x3c   : > { %p155_p4 = scmp.ne.s32.totalorder %s1549_s28, %s1545_s27  ;;  %s2265_s15 = smov (%p63_p2, %s2263_s15), 0 }
  0x3d   : > { %2202 = sst [smem:[#allocation33_spill]] %s2265_s15  ;;  %p150_p5 = scmp.eq.s32.totalorder %s1573_s13, 0 }
  0x3e   : > { %p1736_p6 = scmp.eq.s32.totalorder %s2168_s17, 0  ;;  %s1026_s21 = sshll.u32 %s2265_s15, 2 }
  0x3f   : > { %s206_s16 = sld [smem:[#allocation5 + %s1720_s0]]  ;;  %s133_s1 = sadd.s32 %s1026_s21, %s2261_s14 }
  0x40   : > { %p1745_p7 = por %p1736_p6, %p155_p4  ;;  %s135_s11 = sld [smem:[#allocation5 + %s133_s1]] }
  0x41   : > { %s136_s9 = sld [smem:[#allocation6 + %s133_s1]]  ;;  %s142_s3 = sadd.s32 1, %s1553_s29 }
  0x42   : > { %s2204_s27 = scalar_select %p1745_p7, 1, 0 }
  0x43   : > { %s207_s8 = sld [smem:[#allocation6 + %s1720_s0]]  ;;  %p1756_p8 = por %p150_p5, %p149_p3 }
  0x44   : > { %2205 = sst [smem:[#allocation34_spill]] %s2204_s27  ;;  %p231_p9 = scmp.ne.s32.totalorder %s1537_s25, %s1533_s24 }
  0x45   : > { %s211_s6 = sld [smem:[#allocation5 + %s133_s1]]  ;;  %s218_s21 = sadd.s32 1, %s1541_s26 }
  0x46   : > { %s212_s17 = sld [smem:[#allocation6 + %s133_s1]]  ;;  %s275_s14 = ssub.s32 %s1569_s12, %s2265_s15 }
  0x47   : > { %p1767_p10 = por %p231_p9, %p1736_p6  ;;  %s278_s1 = sadd.s32 1, %s1529_s23 }
  0x48   : > { %s137_s10 = ssub.s32 %s130_s18, %s135_s11  ;;  %s138_s27 = ssub.s32 %s131_s19, %s136_s9 }
  0x49   : > { %s2207_s30 = scalar_select %p1767_p10, 1, 0 }
  0x4a   : > { %s139_s28 = sor.u32 %s138_s27, %s137_s10  ;;  %p276_p12 = scmp.eq.s32.totalorder %s275_s14, 0 }
  0x4b   : > { %s213_s7 = ssub.s32 %s206_s16, %s211_s6  ;;  %p140_p11 = scmp.eq.s32.totalorder %s139_s28, 0 }
  0x4c   : > { %s214_s24 = ssub.s32 %s207_s8, %s212_s17  ;;  %p288_p0 = scmp.ne.s32.totalorder %s1529_s23, %s1525_s22 }
  0x4d   : > { %s215_s20 = sor.u32 %s214_s24, %s213_s7  ;;  %s2210_s28 = sadd.s32 4294967295, %s1573_s13  }
  0x4e   : > { %s1773_s15 = scalar_select %p140_p11, %s1553_s29, %s142_s3  }
  0x4f   : > { %p216_p13 = scmp.eq.s32.totalorder %s215_s20, 0  ;;  %p289_p1 = scmp.eq.s32.totalorder %s2210_s28, 7 }
  0x50   : > { %2208 = sst [smem:[#allocation35_spill]] %s1773_s15  ;;  %p294_p2 = scmp.ne.s32.totalorder %s1525_s22, %s1521_s2 }
  0x51   : > { %s1778_s9 = scalar_select %p276_p12, %s1529_s23, %s278_s1  }
  0x52   : > { %s1781_s6 = scalar_select %p216_p13, %s1541_s26, %s218_s21  }
  0x53   : > { %s2211_s7 = sadd.s32 4294967294, %s1573_s13   ;;  %p1789_p4 = por %p289_p1, %p288_p0 }
  0x54   : > { %2209 = sst [smem:[#allocation36_spill]] %s1781_s6  ;;  %p295_p3 = scmp.eq.s32.totalorder %s2211_s7, 7 }
  0x55   : > { %s2212_s3 = scalar_select %p1789_p4, 1, 0 }
  0x56   : > { %p2179_p6 = scmp.lt.s32.totalorder %s1573_s13, 8  ;;  %p1794_p9 = por %p295_p3, %p294_p2 }
  0x57   : > { %s341_s10 = sand.u32 1, %s1553_s29   ;;  %p225_p11 = scmp.ne.s32.totalorder %s1541_s26, %s1537_s25 }
  0x58   : > { %s2213_s8 = scalar_select %p1794_p9, 1, 0 }
  0x59   : > { %s1035_s11 = sshll.u32 %s341_s10, 8  ;;  %p1805_p12 = pnand %p2179_p6, %p1756_p8 }
  0x5a   : > { %s1167_s17 = scalar_select %p1756_p8, [#allocation5], [#allocation13] }
  0x5b   : > { %s1168_s18 = scalar_select %p1756_p8, %s1720_s0, 0 }
  0x5c   : > { %s2267_s17 = smov (!%p2179_p6, %s1167_s17), [#allocation17]  ;;  %s345_s27 = scalar_lea.vmem [#allocation7], %s1035_s11 }
  0x5d   : > { %s2269_s18 = smov (!%p2179_p6, %s1168_s18), 0  ;;  %s359_s21 = sshll.u32 %s345_s27, 4  ;;  %s1828_s21 = int_to_ptr.vmem [resolvable:$true] %s359_s21 }
  0x5e   : > { %s1169_s19 = scalar_select %p1756_p8, [#allocation6], [#allocation14] }
  0x5f   : > { %s349_s16 = sld [smem:[%s2267_s17 + %s2269_s18]]  ;;  %p1824_p13 = por %p225_p11, %p150_p5 }
  0x60   : > { %s2271_s19 = smov (!%p2179_p6, %s1169_s19), [#allocation18]  ;;  %s391_s20 = sand.u32 1, %s1541_s26  }
  0x61   : > { %s350_s24 = sld [smem:[%s2271_s19 + %s2269_s18]]  ;;  %s1838_s12 = sshll.u32 %s391_s20, 8 }
  0x62   : > { %s1172_s28 = scalar_select %p1824_p13, [#allocation5], [#allocation15] }
  0x63   : > { %s1173_s7 = scalar_select %p1824_p13, %s1720_s0, 0 }
  0x64   : > { %s2216_s5 = sld [smem:[#allocation39_spill]]  ;;  %p1849_p5 = pnand %p2179_p6, %p1824_p13 }
  0x65   : > { %s1038_s4 = sshll.u32 %s349_s16, 5  ;;  %s1853_s19 = scalar_lea.sflag [#allocation8], %s341_s10 }
  0x66   : > { %s2217_s18 = scalar_select %p1849_p5, 1, 0 }
  0x67   : > { %s1037_s11 = sshll.u32 %s350_s24, 1  ;;  %p1363_p0 = pneg %p1805_p12 }
  0x68   : > { %s356_s17 = sadd.s32 %s1038_s4, %s1037_s11 }
  0x69   : > { %s1039_s27 = sshll.u32 %s356_s17, 7 }
  0x6a   : > { %s1843_s6 = scalar_lea.hbm %s2216_s5, %s1039_s27  ;;  %s1366_s24 = scalar_lea.hbm %s2216_s5, 16384 }
  0x6b   : > { %s1361_s16 = scalar_lea.hbm %s1843_s6, 4096  ;;  %p1367_p3 = scmp.lt.u32.totalorder %s1843_s6, %s2216_s5 }
  0x6c   : > { %p1362_p8 = scmp.ne.s32.totalorder %s1843_s6, %s1361_s16  ;;  %p1368_p11 = scmp.lt.u32.totalorder %s1366_s24, %s1361_s16 }
  0x6d   : > { %p1370_p9 = scmp.lt.u32.totalorder %s1361_s16, %s1843_s6 }
  0x6e   : > { %p1364_p1 = pnand %p1363_p0, %p1362_p8  ;;  %p1369_p6 = por %p1368_p11, %p1367_p3 }
  0x70   : > { %p1365_p2 = pneg %p1364_p1  ;;  %p1371_p4 = por %p1370_p9, %p1369_p6 }
  0x72   : > { %p1372_p10 = pnand %p1371_p4, %p1365_p2 }
  0x74   : > { %1375 = shalt.err (!%p1372_p10)
}
  0x75   : > { %s1376_s10 = scalar_lea.vmem %s1828_s21, 4096  ;;  %s1578_s17 = smov [#allocation7]  }
  0x76   : > { %p1377_p8 = scmp.ne.s32.totalorder %s1828_s21, %s1376_s10  ;;  %s1381_s27 = sshll.u32 %s1578_s17, 4  ;;  %s1382_s27 = int_to_ptr.vmem [resolvable:$false] %s1381_s27 }
  0x77   : > { %s1383_s29 = scalar_lea.vmem %s1382_s27, 8192  ;;  %p1384_p5 = scmp.lt.s32.totalorder %s1828_s21, %s1382_s27 }
  0x78   : > { %p1379_p1 = pnand %p1377_p8, %p1363_p0  ;;  %p1385_p3 = scmp.lt.s32.totalorder %s1383_s29, %s1376_s10 }
  0x7a   : > { %p1380_p7 = pneg %p1379_p1  ;;  %p1386_p11 = por %p1385_p3, %p1384_p5 }
  0x7c   : > { %p1387_p6 = pnand %p1386_p11, %p1380_p7 }
  0x7e   : > { %1390 = shalt.err (!%p1387_p6)
}
  0x7f   : > { %s1579_s16 = smov 256   ;;  %s1580_s15 = smov 16  }
  0x80   : > { %1188 = dma.hbm_to_vmem [thread:$0]  (!%p1805_p12), %s1843_s6, 4096, %s1828_s21, %s1853_s19, %s1579_s16, %s1579_s16, %s1580_s15  }
  0x81   : > { %p2218_p7 = scmp.lt.s32.totalorder %s1573_s13, 8  ;;  %p1045_p9 = scmp.ge.s32.totalorder %s1573_s13, 1 }
  0x82   : > { %s1174_s24 = scalar_select %p1824_p13, [#allocation6], [#allocation16] }
  0x83   : > { %s2273_s28 = smov (!%p2218_p7, %s1172_s28), [#allocation19]  ;;  %p2219_p10 = pmov %p2218_p7 }
  0x84   : > { %p2220_p4 = pmov %p2218_p7  ;;  %p431_p5 = scmp.lt.s32.totalorder %s1573_s13, 9 }
  0x85   : > { %s2275_s7 = smov (!%p2219_p10, %s1173_s7), 0  ;;  %s395_s6 = scalar_lea.vmem [#allocation10], %s1838_s12 }
  0x86   : > { %s399_s4 = sld [smem:[%s2273_s28 + %s2275_s7]]  ;;  %s2277_s24 = smov (!%p2220_p4, %s1174_s24), [#allocation20] }
  0x87   : > { %s400_s11 = sld [smem:[%s2277_s24 + %s2275_s7]]  ;;  %s409_s14 = sshll.u32 %s395_s6, 4  ;;  %s1903_s14 = int_to_ptr.vmem [resolvable:$true] %s409_s14 }
  0x88   : > { %p1899_p12 = pnand %p1045_p9, %p431_p5  ;;  %s2222_s27 = sld [smem:[#allocation41_spill]] }
  0x89   : > { %s1912_s12 = scalar_lea.sflag [#allocation11], %s391_s20  ;;  %p2224_p0 = scmp.ne.s32.totalorder %s2217_s18, 0 }
  0x8b   : > { %p1393_p2 = pneg %p2224_p0 }
  0x8c   : > { %s1043_s0 = sshll.u32 %s399_s4, 5 }
  0x8d   : > { %s1042_s1 = sshll.u32 %s400_s11, 5 }
  0x8e   : > { %s406_s19 = sadd.s32 %s1043_s0, %s1042_s1  ;;  %s2223_s16 = smov %s2222_s27 }
  0x8f   : > { %s1044_s10 = sshll.u32 %s406_s19, 7  ;;  %s1396_s4 = scalar_lea.hbm %s2223_s16, 16384 }
  0x90   : > { %s1908_s29 = scalar_lea.hbm %s2222_s27, %s1044_s10 }
  0x91   : > { %s1391_s7 = scalar_lea.hbm %s1908_s29, 4096  ;;  %p1397_p3 = scmp.lt.u32.totalorder %s1908_s29, %s2223_s16 }
  0x92   : > { %p1392_p13 = scmp.ne.s32.totalorder %s1908_s29, %s1391_s7  ;;  %p1398_p11 = scmp.lt.u32.totalorder %s1396_s4, %s1391_s7 }
  0x93   : > { %p1400_p7 = scmp.lt.u32.totalorder %s1391_s7, %s1908_s29 }
  0x94   : > { %p1394_p8 = pnand %p1393_p2, %p1392_p13  ;;  %p1399_p6 = por %p1398_p11, %p1397_p3 }
  0x96   : > { %p1395_p1 = pneg %p1394_p8  ;;  %p1401_p10 = por %p1400_p7, %p1399_p6 }
  0x98   : > { %p1402_p4 = pnand %p1401_p10, %p1395_p1 }
  0x9a   : > { %1405 = shalt.err (!%p1402_p4)
}
  0x9b   : > { %s1406_s20 = scalar_lea.vmem %s1903_s14, 4096  ;;  %s1581_s0 = smov [#allocation10]  }
  0x9c   : > { %p1407_p9 = scmp.ne.s32.totalorder %s1903_s14, %s1406_s20  ;;  %s1411_s1 = sshll.u32 %s1581_s0, 4  ;;  %s1412_s1 = int_to_ptr.vmem [resolvable:$false] %s1411_s1 }
  0x9d   : > { %s1413_s19 = scalar_lea.vmem %s1412_s1, 8192  ;;  %p1414_p8 = scmp.lt.s32.totalorder %s1903_s14, %s1412_s1 }
  0x9e   : > { %p1409_p5 = pnand %p1407_p9, %p1393_p2  ;;  %p1415_p3 = scmp.lt.s32.totalorder %s1413_s19, %s1406_s20 }
  0xa0   : > { %p1410_p13 = pneg %p1409_p5  ;;  %p1416_p11 = por %p1415_p3, %p1414_p8 }
  0xa2   : > { %p1417_p6 = pnand %p1416_p11, %p1410_p13 }
  0xa4   : > { %1420 = shalt.err (!%p1417_p6)
}
  0xa5   : > { %s1582_s10 = smov 128   ;;  %s1583_s28 = smov 8  }
  0xa6   : > { %1195 = dma.hbm_to_vmem [thread:$0]  (!%p2224_p0), %s1908_s29, 4096, %s1903_s14, %s1912_s12, %s1582_s10, %s1582_s10, %s1583_s28  }
  0xa7   : > { %435 = sbr.rel (%p1899_p12) target bundleno = 736 (0x2e0), region = 44  ;;  %s2225_s17 = sld [smem:[#allocation26_spill]] (!%p1899_p12) }
  0xa8   : > { %s2226_s27 = sld [smem:[#allocation34_spill]] (!%p1899_p12) }
  0xad   : > { %s437_s7 = sand.u32 (!%p1899_p12), 1, %s2225_s17  }
  0xae   : > { %s1046_s15 = sshll.u32 %s437_s7, 8  ;;  %s438_s24 = scalar_lea.sflag [#allocation8], %s437_s7 }
  0xaf   : > { %s1943_s4 = scalar_lea.vmem [#allocation7], %s1046_s15  ;;  %p2227_p2 = scmp.ne.s32.totalorder %s2226_s27, 0 }
  0xb1   : > { %1508 = dma.done.wait (%p2227_p2), %s438_s24, 4096  }
  0xb2   : > { %1510 = vsyncadd (%p2227_p2), %s438_s24, 4294963200  ;;  %s446_s11 = sand.u32 1, %s1537_s25   ;;  %p2228_p12 = scmp.ne.s32.totalorder %s2207_s30, 0 }
  0xb3   : > { %s1047_s18 = sshll.u32 %s446_s11, 8  ;;  %s447_s14 = scalar_lea.sflag [#allocation11], %s446_s11 }
  0xb4   : > { %s1950_s29 = scalar_lea.vmem [#allocation10], %s1047_s18 }
  0xb5   : > { %1512 = dma.done.wait (%p2228_p12), %s447_s14, 4096  }
  0xb6   : > { %1514 = vsyncadd (%p2228_p12), %s447_s14, 4294963200  ;;  %s2229_s21 = sld [smem:[#allocation29_spill]]  ;;  %s2230_s12 = sld [smem:[#allocation28_spill]] }
  0xb7   : > { %s2185_s1 = sand.u32 1, %s1525_s22   ;;  %s2231_s7 = sld [smem:[#allocation38_spill]] }
  0xb8   : > { %s1968_s28 = sshll.u32 %s2185_s1, 3  ;;  %s2232_s1 = sld [smem:[#allocation37_spill]] }
  0xb9   : > { %s519_s16 = scalar_lea.vmem [#allocation12], %s1968_s28 }
  0xbc   : > { %s1049_s6 = sshll.u32 %s2229_s21, 2  ;;  %p526_p0 = scmp.lt.s32.totalorder %s2229_s21, 1 }
  0xbd   : > { %s1959_s20 = sadd.s32 %s2230_s12, %s1049_s6  ;;  %p582_p1 = scmp.eq.s32.totalorder %s2230_s12, 0 }
  0xbe   : > { %s523_s0 = sld [smem:[#allocation5 + %s1959_s20]]  ;;  %s2279_s21 = smov (!%p526_p0, %s2229_s21), 1  ;;  %v1584_v0 = vmov (%p582_p1), 0.0  }
  0xbf   : > { %s549_s30 = sld [smem:[#allocation5 + %s1959_s20]]  ;;  %s1052_s10 = sshll.u32 %s2279_s21, 3  ;;  %588 = vst [vmem:[#allocation2] sm:$0xff] (%p582_p1), %v1584_v0 }
  0xc0   : > { %s550_s19 = sld [smem:[#allocation6 + %s1959_s20]]  ;;  %s1973_s15 = scalar_lea.vmem %s2231_s7, %s1052_s10 }
  0xc1   : > { %s574_s24 = sld [smem:[#allocation5 + %s1959_s20]] }
  0xc4   : > { %p524_p7 = scmp.lt.s32.totalorder %s523_s0, 3 }
  0xc5   : > { %p552_p10 = scmp.lt.s32.totalorder %s549_s30, 3 }
  0xc6   : > { %s2281_s0 = smov (!%p524_p7, %s523_s0), 3  ;;  %s1054_s11 = sshll.u32 %s550_s19, 1 }
  0xc7   : > { %s1050_s18 = sshll.u32 %s2281_s0, 1  ;;  %p554_p4 = scmp.lt.s32.totalorder %s1054_s11, 1 }
  0xc8   : > { %s529_s14 = sadd.s32 %s1050_s18, %s2279_s21  ;;  %p575_p9 = scmp.lt.s32.totalorder %s574_s24, 3 }
  0xc9   : > { %s1051_s6 = sshll.u32 %s529_s14, 3  ;;  %s2283_s30 = smov (!%p552_p10, %s549_s30), 3 }
  0xca   : > { %s1980_s26 = scalar_lea.vmem %s2232_s1, %s1051_s6  ;;  %s2285_s11 = smov (!%p554_p4, %s1054_s11), 1 }
  0xcb   : > { %s1055_s10 = sshll.u32 %s2283_s30, 1  ;;  %s2233_s19 = sld [smem:[#allocation40_spill]] }
  0xcc   : > { %s1982_s17 = sadd.s32 %s1055_s10, %s2285_s11  ;;  %s2287_s24 = smov (!%p575_p9, %s574_s24), 3 }
  0xcd   : > { %s2234_s14 = sld [smem:[#allocation42_spill]]  ;;  %587 = sbr.rel (!%p582_p1) target bundleno = 212 (0xd4), region = 56 }
  0xd1   : > { %s558_s0 = scalar_lea.vmem %s2233_s19, %s1982_s17 }
  0xd3   : > { %s577_s5 = scalar_lea.vmem %s2234_s14, %s2287_s24 }
  0xd4 PF: > { %s591_s1 = sld [smem:[#allocation4 + %s1959_s20]] }
  0xda   : > { %p1059_p5 = scmp.eq.s32.totalorder %s591_s1, 0 }
  0xdb   : > { %v598_v1 = vld [vmem:[%s1943_s4 + $0x8] sm:$0xff] (!%p1059_p5)  ;;  %v600_v2 = vld [vmem:[%s1943_s4 + $0x18] sm:$0xff] (!%p1059_p5)  ;;  %v597_v3 = vld [vmem:[%s1943_s4] sm:$0xff] (!%p1059_p5)  ;;  %v1585_v8 = vmov (!%p1059_p5), 0.0  }
  0xdc   : > { %595 = sbr.rel (%p1059_p5) target bundleno = 694 (0x2b6), region = 60  ;;  %v1103_v4 = vpack.c.bf16 (!%p1059_p5), %v600_v2, %v598_v1  ;;  %v599_v5 = vld [vmem:[%s1943_s4 + $0x10] sm:$0xff] (!%p1059_p5)  ;;  %v602_v6 = vld [vmem:[%s1943_s4 + $0x28] sm:$0xff] (!%p1059_p5)  ;;  %v604_v7 = vld [vmem:[%s1943_s4 + $0x38] sm:$0xff] (!%p1059_p5)  ;;  %705 = vmatprep.mubr.f32.mxu0 (!%p1059_p5), %v1585_v8 }
  0xdd   : > { %v1105_v9 = vpack.c.bf16 (!%p1059_p5), %v599_v5, %v597_v3  ;;  %v1107_v10 = vpack.c.bf16 (!%p1059_p5), %v604_v7, %v602_v6  ;;  %v601_v11 = vld [vmem:[%s1943_s4 + $0x20] sm:$0xff] (!%p1059_p5)  ;;  %v603_v12 = vld [vmem:[%s1943_s4 + $0x30] sm:$0xff] (!%p1059_p5)  ;;  %v606_v13 = vld [vmem:[%s1943_s4 + $0x48] sm:$0xff] (!%p1059_p5) }
  0xde   : > { %1104 = vmatprep.subr.bf16.mxu0 (!%p1059_p5), %v1103_v4  ;;  %v608_v14 = vld [vmem:[%s1943_s4 + $0x58] sm:$0xff] (!%p1059_p5)  ;;  %v1109_v15 = vpack.c.bf16 (!%p1059_p5), %v603_v12, %v601_v11  ;;  %v605_v17 = vld [vmem:[%s1943_s4 + $0x40] sm:$0xff] (!%p1059_p5)  ;;  %v607_v18 = vld [vmem:[%s1943_s4 + $0x50] sm:$0xff] (!%p1059_p5) }
  0xdf   : > { %1106 = vmatpush1.bf16.msra.mxu0 (!%p1059_p5), %v1105_v9  ;;  %v1111_v16 = vpack.c.bf16 (!%p1059_p5), %v608_v14, %v606_v13  ;;  %v610_v19 = vld [vmem:[%s1943_s4 + $0x68] sm:$0xff] (!%p1059_p5)  ;;  %v612_v20 = vld [vmem:[%s1943_s4 + $0x78] sm:$0xff] (!%p1059_p5)  ;;  %v1113_v21 = vpack.c.bf16 (!%p1059_p5), %v607_v18, %v605_v17  ;;  %v609_v23 = vld [vmem:[%s1943_s4 + $0x60] sm:$0xff] (!%p1059_p5) }
  0xe0   : > { %1108 = vmatprep.subr.bf16.mxu0 (!%p1059_p5), %v1107_v10  ;;  %v1115_v22 = vpack.c.bf16 (!%p1059_p5), %v612_v20, %v610_v19  ;;  %v611_v24 = vld [vmem:[%s1943_s4 + $0x70] sm:$0xff] (!%p1059_p5)  ;;  %v614_v25 = vld [vmem:[%s1943_s4 + $0x88] sm:$0xff] (!%p1059_p5)  ;;  %v616_v26 = vld [vmem:[%s1943_s4 + $0x98] sm:$0xff] (!%p1059_p5) }
  0xe1   : > { %v613_v27 = vld [vmem:[%s1943_s4 + $0x80] sm:$0xff] (!%p1059_p5)  ;;  %v615_v28 = vld [vmem:[%s1943_s4 + $0x90] sm:$0xff] (!%p1059_p5)  ;;  %v731_v30 = vld [vmem:[%s1950_s29 + $0x88] sm:$0xff] (!%p1059_p5)  ;;  %v1117_v32 = vpack.c.bf16 (!%p1059_p5), %v611_v24, %v609_v23  ;;  %v1119_v37 = vpack.c.bf16 (!%p1059_p5), %v616_v26, %v614_v25 }
  0xe2   : > { %v730_v29 = vld [vmem:[%s1950_s29 + $0x80] sm:$0xff] (!%p1059_p5)  ;;  %v715_v34 = vld [vmem:[%s1950_s29 + $0x8] sm:$0xff] (!%p1059_p5)  ;;  %v732_v35 = vld [vmem:[%s1950_s29 + $0x90] sm:$0xff] (!%p1059_p5)  ;;  %v1121_v47 = vpack.c.bf16 (!%p1059_p5), %v615_v28, %v613_v27 }
  0xe3   : > { %1110 = vmatpush1.bf16.msra.mxu0 %v1109_v15  ;;  %v714_v31 = vld [vmem:[%s1950_s29] sm:$0xff]  ;;  %v1135_v33 = vpack.c.bf16 %v731_v30, %v730_v29  ;;  %v733_v36 = vld [vmem:[%s1950_s29 + $0x98] sm:$0xff]  ;;  %v716_v40 = vld [vmem:[%s1950_s29 + $0x10] sm:$0xff] }
  0xe4   : > { %1112 = vmatprep.subr.bf16.mxu0 %v1111_v16  ;;  %v1137_v38 = vpack.c.bf16 %v715_v34, %v714_v31  ;;  %v1139_v39 = vpack.c.bf16 %v733_v36, %v732_v35  ;;  %v717_v41 = vld [vmem:[%s1950_s29 + $0x18] sm:$0xff]  ;;  %v734_v42 = vld [vmem:[%s1950_s29 + $0xa0] sm:$0xff]  ;;  %v618_v43 = vld [vmem:[%s1943_s4 + $0xa8] sm:$0xff]  ;;  %v1586_v36 = vmov 0  }
  0xe5   : > { %v620_v44 = vld [vmem:[%s1943_s4 + $0xb8] sm:$0xff]  ;;  %1136 = vmatprep.subr.bf16.mxu1 %v1135_v33  ;;  %v735_v45 = vld [vmem:[%s1950_s29 + $0xa8] sm:$0xff]  ;;  %v1141_v46 = vpack.c.bf16 %v717_v41, %v716_v40  ;;  %v617_v48 = vld [vmem:[%s1943_s4 + $0xa0] sm:$0xff]  ;;  %1324 = vset.pattern.permute.xlu0 %v1586_v36 }
  0xe6   : > { %1138 = vmatpush3.bf16.msra.mxu1 %v1137_v38  ;;  %v1143_v49 = vpack.c.bf16 %v735_v45, %v734_v42  ;;  %v718_v50 = vld [vmem:[%s1950_s29 + $0x20] sm:$0xff]  ;;  %v719_v51 = vld [vmem:[%s1950_s29 + $0x28] sm:$0xff]  ;;  %v1123_v52 = vpack.c.bf16 %v620_v44, %v618_v43  ;;  %v619_v53 = vld [vmem:[%s1943_s4 + $0xb0] sm:$0xff] }
  0xe7   : > { %1114 = vmatpush1.bf16.msra.mxu0 %v1113_v21  ;;  %1140 = vmatprep.subr.bf16.mxu1 %v1139_v39  ;;  %v736_v54 = vld [vmem:[%s1950_s29 + $0xb0] sm:$0xff]  ;;  %v737_v55 = vld [vmem:[%s1950_s29 + $0xb8] sm:$0xff]  ;;  %v622_v56 = vld [vmem:[%s1943_s4 + $0xc8] sm:$0xff]  ;;  %v1145_v58 = vpack.c.bf16 %v719_v51, %v718_v50  ;;  %v1125_v59 = vpack.c.bf16 %v619_v53, %v617_v48 }
  0xe8   : > { %1116 = vmatprep.subr.bf16.mxu0 %v1115_v22  ;;  %v624_v57 = vld [vmem:[%s1943_s4 + $0xd8] sm:$0xff]  ;;  %v621_v60 = vld [vmem:[%s1943_s4 + $0xc0] sm:$0xff]  ;;  %v1147_v61 = vpack.c.bf16 %v737_v55, %v736_v54  ;;  %v720_v62 = vld [vmem:[%s1950_s29 + $0x30] sm:$0xff] }
  0xe9   : > { %v721_v63 = vld [vmem:[%s1950_s29 + $0x38] sm:$0xff]  ;;  %v1127_v0 = vpack.c.bf16 %v624_v57, %v622_v56  ;;  %v623_v1 = vld [vmem:[%s1943_s4 + $0xd0] sm:$0xff]  ;;  %v738_v2 = vld [vmem:[%s1950_s29 + $0xc0] sm:$0xff] }
  0xea   : > { %1142 = vmatpush3.bf16.msra.mxu1 %v1141_v46  ;;  %v739_v3 = vld [vmem:[%s1950_s29 + $0xc8] sm:$0xff]  ;;  %v628_v5 = vld [vmem:[%s1943_s4 + $0xf8] sm:$0xff]  ;;  %v1149_v6 = vpack.c.bf16 %v721_v63, %v720_v62  ;;  %v1129_v7 = vpack.c.bf16 %v623_v1, %v621_v60  ;;  %v625_v8 = vld [vmem:[%s1943_s4 + $0xe0] sm:$0xff] }
  0xeb   : > { %1118 = vmatpush1.bf16.msra.mxu0 %v1117_v32  ;;  %1144 = vmatprep.subr.bf16.mxu1 %v1143_v49  ;;  %v626_v4 = vld [vmem:[%s1943_s4 + $0xe8] sm:$0xff]  ;;  %v1151_v9 = vpack.c.bf16 %v739_v3, %v738_v2  ;;  %v722_v10 = vld [vmem:[%s1950_s29 + $0x40] sm:$0xff]  ;;  %v627_v13 = vld [vmem:[%s1943_s4 + $0xf0] sm:$0xff] }
  0xec   : > { %1120 = vmatprep.subr.bf16.mxu0 %v1119_v37  ;;  %v723_v11 = vld [vmem:[%s1950_s29 + $0x48] sm:$0xff]  ;;  %v1131_v12 = vpack.c.bf16 %v628_v5, %v626_v4  ;;  %v740_v14 = vld [vmem:[%s1950_s29 + $0xd0] sm:$0xff]  ;;  %v741_v15 = vld [vmem:[%s1950_s29 + $0xd8] sm:$0xff]  ;;  %v1133_v17 = vpack.c.bf16 %v627_v13, %v625_v8  ;;  %v631_v37 = vlaneseq }
  0xed   : > { %v1153_v16 = vpack.c.bf16 %v723_v11, %v722_v10  ;;  %v1155_v18 = vpack.c.bf16 %v741_v15, %v740_v14  ;;  %v724_v19 = vld [vmem:[%s1950_s29 + $0x50] sm:$0xff]  ;;  %v725_v20 = vld [vmem:[%s1950_s29 + $0x58] sm:$0xff]  ;;  %v742_v21 = vld [vmem:[%s1950_s29 + $0xe0] sm:$0xff] }
  0xee   : > { %1146 = vmatpush3.bf16.msra.mxu1 %v1145_v58  ;;  %v743_v22 = vld [vmem:[%s1950_s29 + $0xe8] sm:$0xff]  ;;  %v1157_v23 = vpack.c.bf16 %v725_v20, %v724_v19  ;;  %v596_v24 = vld [vmem:[%s1973_s15] sm:$0xff]  ;;  %v726_v26 = vld [vmem:[%s1950_s29 + $0x60] sm:$0xff]  ;;  %v632_v38 = vshrl.u32 %v631_v37, 7 }
  0xef   : > { %1122 = vmatpush1.bf16.msra.mxu0 %v1121_v47  ;;  %1148 = vmatprep.subr.bf16.mxu1 %v1147_v61  ;;  %v1159_v25 = vpack.c.bf16 %v743_v22, %v742_v21  ;;  %v727_v27 = vld [vmem:[%s1950_s29 + $0x68] sm:$0xff]  ;;  %v744_v29 = vld [vmem:[%s1950_s29 + $0xf0] sm:$0xff]  ;;  %v745_v30 = vld [vmem:[%s1950_s29 + $0xf8] sm:$0xff] }
  0xf0   : > { %1124 = vmatprep.subr.bf16.mxu0 %v1123_v52  ;;  %v1161_v28 = vpack.c.bf16 %v727_v27, %v726_v26  ;;  %v1163_v31 = vpack.c.bf16 %v745_v30, %v744_v29  ;;  %v728_v32 = vld [vmem:[%s1950_s29 + $0x70] sm:$0xff]  ;;  %v729_v33 = vld [vmem:[%s1950_s29 + $0x78] sm:$0xff]  ;;  %v633_v39 = vsub.s32 0, %v632_v38  ;;  %v637_v41 = vsub.s32 1, %v632_v38 }
  0xf1   : > { %v1165_v34 = vpack.c.bf16 %v729_v33, %v728_v32  ;;  %v824_v35 = vld [vmem:[%s1980_s26] sm:$0xff] }
  0xf2   : > { %1150 = vmatpush3.bf16.msra.mxu1 %v1149_v6  ;;  %827 = vperm.xlu0 %1324, %v824_v35   ;;  %v629_v40 = vld [vmem:[%s558_s0] sm:$0x3] }
  0xf3   : > { %1126 = vmatpush1.bf16.msra.mxu0 %v1125_v59  ;;  %1152 = vmatprep.subr.bf16.mxu1 %v1151_v9  ;;  %v634_v42 = vrot.slane %v629_v40, %v633_v39  ;;  %v638_v43 = vrot.slane %v629_v40, %v637_v41  ;;  %v1060_v52 = vld [vmem:[%s577_s5] ss:$0 sm:$0xff] }
  0xf4   : > { %1128 = vmatprep.subr.bf16.mxu0 %v1127_v0  ;;  %v823_v56 = vld [vmem:[#allocation2] sm:$0xff] }
  0xf6   : > { %1154 = vmatpush3.bf16.msra.mxu1 %v1153_v16 }
  0xf7   : > { %1130 = vmatpush1.bf16.msra.mxu0 %v1129_v7  ;;  %1156 = vmatprep.subr.bf16.mxu1 %v1155_v18 }
  0xf8   : > { %1132 = vmatprep.subr.bf16.mxu0 %v1131_v12 }
  0xfa   : > { %1158 = vmatpush3.bf16.msra.mxu1 %v1157_v23 }
  0xfb   : > { %1134 = vmatpush1.bf16.msra.mxu0 %v1133_v17  ;;  %1160 = vmatprep.subr.bf16.mxu1 %v1159_v25 }
  0xfe   : > { %706 = vmatmul.mubr.f32.vlgmr.msra.gmra.mrb[0].mxu0 %v596_v24  ;;  %1162 = vmatpush3.bf16.msra.mxu1 %v1161_v28 }
  0xff   : > { %1164 = vmatprep.subr.bf16.mxu1 %v1163_v31 }
 0x102   : > { %1166 = vmatpush3.bf16.msra.mxu1 %v1165_v34 }
 0x171   : > { %v828_v54 = vpop.permute.xlu0 %827 }
 0x1d1   : > { %v707_v44 = vpop.f32.mrb[0].mxu0 }
 0x1d2   : > { %v708_v45 = vadd.f32 %v707_v44, %v634_v42  ;;  %v709_v46 = vpop.f32.mrb[1].mxu0 }
 0x1d3   : > { %v710_v47 = vadd.f32 %v709_v46, %v638_v43 }
 0x1d4   : > { %v712_v49 = vmax.f32 %v708_v45, 0.0 }
 0x1d5   : > { %v713_v48 = vmax.f32 %v710_v47, 0.0 }
 0x1d7   : > { %817 = vmatprep.mubr.f32.mxu1 %v713_v48 }
 0x1d8   : > { %818 = vmatmul.mubr.f32.vlgmr.msra.gmra.mrb[0].mxu1 %v712_v49 }
 0x2ab   : > { %v1100_v50 = vpop.f32.mrb[0].mxu1 }
 0x2ac   : > { %v1101_v51 = vpop.f32.mrb[1].mxu1 }
 0x2ad   : > { %v1102_v53 = vadd.f32 %v1101_v51, %v1100_v50 }
 0x2af   : > { %v820_v55 = vadd.f32 %v1102_v53, %v1060_v52 }
 0x2b1   : > { %v830_v57 = vmul.f32 %v828_v54, %v820_v55 }
 0x2b3   : > { %v831_v58 = vadd.f32 %v830_v57, %v823_v56 }
 0x2b5   : > { %832 = vst [vmem:[#allocation2] sm:$0xff] %v831_v58 }
 0x2b6 PF: > { %s2237_s15 = sld [smem:[#allocation28_spill]] }
 0x2bc   : > { %p833_p13 = scmp.eq.s32.totalorder %s2237_s15, 3 }
 0x2bd   : > { %v838_v59 = vld [vmem:[#allocation2] sm:$0xff] (%p833_p13) }
 0x2be   : > { %837 = sbr.rel (!%p833_p13) target bundleno = 709 (0x2c5), region = 64  ;;  %839 = vst [vmem:[%s519_s16] sm:$0xff] (%p833_p13), %v838_v59 }
 0x2c5 PF: > { %s2238_s11 = sld [smem:[#allocation29_spill]]  ;;  %s2239_s17 = sld [smem:[#allocation43_spill]] }
 0x2c6   : > { %s854_s7 = sshll.u32 %s519_s16, 4  ;;  %s2240_s19 = sand.u32 1, %s1525_s22   ;;  %s855_s7 = int_to_ptr.vmem [resolvable:$true] %s854_s7 }
 0x2c7   : > { %s841_s0 = scalar_lea.sflag [#allocation9], %s2240_s19  ;;  %s1421_s21 = scalar_lea.vmem %s855_s7, 128 }
 0x2c8   : > { %p1422_p8 = scmp.ne.s32.totalorder %s855_s7, %s1421_s21  ;;  %p2241_p3 = scmp.ne.s32.totalorder %s2212_s3, 0 }
 0x2c9   : > { %s1587_s18 = smov [#allocation12]  }
 0x2ca   : > { %p1423_p11 = pnand %p1422_p8, %p2241_p3  ;;  %s1425_s14 = sshll.u32 %s1587_s18, 4  ;;  %s1426_s14 = int_to_ptr.vmem [resolvable:$false] %s1425_s14 }
 0x2cb   : > { %s1063_s24 = sshll.u32 %s2238_s11, 7  ;;  %s1427_s5 = scalar_lea.vmem %s1426_s14, 256 }
 0x2cc   : > { %s2081_s27 = scalar_lea.hbm %s2239_s17, %s1063_s24  ;;  %p1424_p6 = pneg %p1423_p11 }
 0x2cd   : > { %p1428_p2 = scmp.lt.s32.totalorder %s855_s7, %s1426_s14  ;;  %p1429_p12 = scmp.lt.s32.totalorder %s1427_s5, %s1421_s21 }
 0x2cf   : > { %p1430_p0 = por %p1429_p12, %p1428_p2 }
 0x2d1   : > { %p1431_p1 = pnand %p1430_p0, %p1424_p6 }
 0x2d3   : > { %1434 = shalt.err (!%p1431_p1)
}
 0x2d4   : > { %s1435_s28 = scalar_lea.hbm %s2081_s27, 128  ;;  %s1439_s4 = scalar_lea.hbm %s2239_s17, 256 }
 0x2d5   : > { %p1436_p7 = scmp.ne.s32.totalorder %s2081_s27, %s1435_s28  ;;  %p1440_p9 = scmp.lt.u32.totalorder %s2081_s27, %s2239_s17 }
 0x2d6   : > { %p1441_p5 = scmp.lt.u32.totalorder %s1439_s4, %s1435_s28  ;;  %p1443_p8 = scmp.lt.u32.totalorder %s1435_s28, %s2081_s27 }
 0x2d7   : > { %p1437_p10 = pnand %p1436_p7, %p2241_p3 }
 0x2d8   : > { %p1442_p13 = por %p1441_p5, %p1440_p9 }
 0x2d9   : > { %p1438_p4 = pneg %p1437_p10 }
 0x2da   : > { %p1444_p11 = por %p1443_p8, %p1442_p13 }
 0x2dc   : > { %p1445_p6 = pnand %p1444_p11, %p1438_p4 }
 0x2de   : > { %1448 = shalt.err (!%p1445_p6)
}
 0x2df   : > { %1179 = dma.vmem_to_hbm [thread:$0]  (%p2241_p3), %s855_s7, 128, %s2081_s27, %s841_s0  }
 0x2e0 PF: > { %p1201_p2 = scmp.ge.s32.totalorder %s1573_s13, 2  ;;  %s866_s26 = sand.u32 1, %s1521_s2  }
 0x2e1   : > { %p2242_p12 = scmp.ne.s32.totalorder %s2213_s8, 0  ;;  %s867_s29 = scalar_lea.sflag [#allocation9], %s866_s26 }
 0x2e3   : > { %p1197_p0 = pnand %p1201_p2, %p2242_p12 }
 0x2e5   : > { %1516 = dma.done.wait (!%p1197_p0), %s867_s29, 128  }
 0x2e6   : > { %1518 = vsyncadd (!%p1197_p0), %s867_s29, 4294967168  ;;  %s42_s13 = sadd.s32 1, %s1573_s13   ;;  %s2244_s3 = sld [smem:[#allocation25_spill]] }
 0x2e7   : > { %p2109_p1 = scmp.ge.s32.totalorder %s42_s13, 10   ;;  %s2245_s26 = sld [smem:[#allocation36_spill]] }
 0x2e8   : > { %s2246_s27 = sld [smem:[#allocation26_spill]]  ;;  %s2247_s28 = sld [smem:[#allocation27_spill]] }
 0x2e9   : > { %s2248_s29 = sld [smem:[#allocation35_spill]]  ;;  %s2249_s8 = sld [smem:[#allocation30_spill]] }
 0x2ea   : > { %s2250_s10 = sld [smem:[#allocation31_spill]]  ;;  %s2251_s11 = sld [smem:[#allocation32_spill]] }
 0x2eb   : > { %s2252_s12 = sld [smem:[#allocation33_spill]]  ;;  %s2254_s2 = smov %s1525_s22 }
 0x2ec   : > { %s2255_s22 = smov %s1529_s23  ;;  %s2256_s23 = smov %s1778_s9 }
 0x2ed   : > { %s2257_s24 = smov %s1537_s25  ;;  %s2258_s25 = smov %s2244_s3 }
 0x2ee   :  { %41 = sbr.rel (!%p2109_p1) target bundleno = 50 (0x32), region = 126 }
 0x2ef   : > { %s2259_s30 = smov %s2249_s8 }
 0x2f5   :  { %872 = vsyncpa [#allocation8], 1 }
 0x2f6   :  { %874 = vsyncpa [#allocation8 + $0x1], 1 }
 0x2f7   :  { %875 = vsyncpa [#allocation11], 1 }
 0x2f8   :  { %877 = vsyncpa [#allocation11 + $0x1], 1 }
 0x2f9   :  { %878 = vsyncpa [#allocation9], 1 }
 0x2fa   :  { %880 = vsyncpa [#allocation9 + $0x1], 1 }

</bundles_post_ra>
